<compile_context>
chip_gen: v5e
topology: v5e:2x2
jax: 0.10.0
libtpu: 0.0.40
codegen_flags: <defaults>
</compile_context>

<pallas_src>
import functools

import jax
import jax.numpy as jnp
from jax.experimental import pallas as pl
from jax.experimental.pallas import tpu as pltpu


# ----------------------------------------------------------------------------- kernels
def _fused_small_kernel(x_ref, p_ref, o_ref):
    """Row-major small-batch kernel.

    x: (B, 3), p: (4, 3) packed [W (rows 0..2); b (row 3)], o: (B, 3).
    out = x @ W + b, computed as 3 broadcast FMAs on the VPU.
    """
    x = x_ref[...]
    p = p_ref[...]
    out = p[3:4, :]                         # bias row, (1, 3) broadcasts to (B, 3)
    out = out + x[:, 0:1] * p[0:1, :]
    out = out + x[:, 1:2] * p[1:2, :]
    out = out + x[:, 2:3] * p[2:3, :]
    o_ref[...] = out.astype(o_ref.dtype)


def _fused_lane_dense_kernel(xT_ref, pT_ref, oT_ref):
    """Lane-dense large-batch kernel (batch on the 128-lane axis).

    xT: (3, TB), pT: (3, 4) packed [W.T (cols 0..2); b (col 3)], oT: (3, TB).
    oT[j, n] = b[j] + sum_k W[k, j] * xT[k, n]
    """
    xT = xT_ref[...]
    pT = pT_ref[...]
    out = pT[:, 3:4]                        # bias column, (3, 1) broadcasts to (3, TB)
    out = out + pT[:, 0:1] * xT[0:1, :]
    out = out + pT[:, 1:2] * xT[1:2, :]
    out = out + pT[:, 2:3] * xT[2:3, :]
    oT_ref[...] = out.astype(oT_ref.dtype)


# ------------------------------------------------------------------------- param fold
def _fold_params(w1, b1, w2, b2):
    """Fold fc1, fc2 and the `out + out` doubling into one (W, b) pair.

    PyTorch layout: w1 (4,3), b1 (4,), w2 (3,4), b2 (3,).
      y = 2*((x @ w1.T + b1) @ w2.T + b2) = x @ W + b
    """
    W = 2.0 * (w1.T @ w2.T)                 # (3, 3) [in_features, out_features]
    b = 2.0 * (b1 @ w2.T + b2)              # (3,)
    return W, b


_LANE_DENSE_THRESHOLD = 128                 # switch to batch-on-lanes layout above this
_MAX_TILE_ROWS = 2048                       # batch tile (rows) for the streaming path


def _round_up(n, m):
    return ((n + m - 1) // m) * m


# ---------------------------------------------------------------------------- forward
@jax.jit
def demo_model_forward(x, w1, b1, w2, b2):
    """x: [B, 3]; w1: [4, 3]; b1: [4]; w2: [3, 4]; b2: [3] (PyTorch Linear layout).

    Entire forward (parameter fold + Pallas call) compiles into one executable.
    """
    B = x.shape[0]
    n_out = w2.shape[0]
    W, b = _fold_params(w1, b1, w2, b2)

    if B < _LANE_DENSE_THRESHOLD:
        # --- tiny-batch path: grid-less, whole arrays VMEM-resident, one packed param.
        packed = jnp.concatenate([W, b[None, :]], axis=0)      # (4, 3)
        return pl.pallas_call(
            _fused_small_kernel,
            out_shape=jax.ShapeDtypeStruct((B, n_out), x.dtype),
            in_specs=[
                pl.BlockSpec(memory_space=pltpu.MemorySpace.VMEM),
                pl.BlockSpec(memory_space=pltpu.MemorySpace.VMEM),
            ],
            out_specs=pl.BlockSpec(memory_space=pltpu.MemorySpace.VMEM),
        )(x, packed)

    # --- large-batch path: lane-dense layout, batch grid, params VMEM-resident.
    packed_t = jnp.concatenate([W.T, b[:, None]], axis=1)       # (3, 4)
    xT = x.T                                                    # (3, B) — batch on lanes
    tb = min(_MAX_TILE_ROWS, _round_up(B, 128))
    grid = (pl.cdiv(B, tb),)

    oT = pl.pallas_call(
        _fused_lane_dense_kernel,
        out_shape=jax.ShapeDtypeStruct((3, B), x.dtype),
        grid=grid,
        in_specs=[
            pl.BlockSpec((3, tb), lambda i: (0, i)),            # streamed batch tile
            pl.BlockSpec((3, 4), lambda i: (0, 0)),             # params fetched once
        ],
        out_specs=pl.BlockSpec((3, tb), lambda i: (0, i)),
        compiler_params=pltpu.CompilerParams(
            dimension_semantics=("parallel",),                  # v7x: 2 TCs split batch
        ),
    )(xT, packed_t)
    return oT.T                                                 # back to (B, 3)


def reference_forward(x, w1, b1, w2, b2):
    h = x @ w1.T + b1
    out = h @ w2.T + b2
    return out + out


# ------------------------------------------------------------------------------- main
if __name__ == "__main__":
    key = jax.random.PRNGKey(0)
    kx, k1, k2, k3, k4, kx2 = jax.random.split(key, 6)

    # Deterministic parameter init (shapes from nn.Linear(3,4) / nn.Linear(4,3)).
    w1 = jax.random.uniform(k1, (4, 3), dtype=jnp.float32, minval=-0.5, maxval=0.5)
    b1 = jax.random.uniform(k2, (4,), dtype=jnp.float32, minval=-0.5, maxval=0.5)
    w2 = jax.random.uniform(k3, (3, 4), dtype=jnp.float32, minval=-0.5, maxval=0.5)
    b2 = jax.random.uniform(k4, (3,), dtype=jnp.float32, minval=-0.5, maxval=0.5)

    # Small-batch path (grid-less, packed params).
    batch = 8
    x = jax.random.normal(kx, (batch, 3), dtype=jnp.float32)
    out = jax.block_until_ready(demo_model_forward(x, w1, b1, w2, b2))
    ref = reference_forward(x, w1, b1, w2, b2)
    assert out.shape == (batch, 3)
    assert jnp.allclose(out, ref, atol=1e-5, rtol=1e-5), "small-batch mismatch vs reference"

    # Large-batch path (lane-dense layout + batch grid).
    big_batch = 256
    x_big = jax.random.normal(kx2, (big_batch, 3), dtype=jnp.float32)
    out_big = jax.block_until_ready(demo_model_forward(x_big, w1, b1, w2, b2))
    ref_big = reference_forward(x_big, w1, b1, w2, b2)
    assert out_big.shape == (big_batch, 3)
    assert jnp.allclose(out_big, ref_big, atol=1e-5, rtol=1e-5), "large-batch mismatch vs reference"

    print("KERNEL_OK")
</pallas_src>

<mosaic_0001>
module attributes {stable_mosaic.version = 11 : i64} {
  func.func @_fused_small_kernel(%arg0: memref<8x3xf32, #tpu.memory_space<vmem>>, %arg1: memref<4x3xf32, #tpu.memory_space<vmem>>, %arg2: memref<8x3xf32, #tpu.memory_space<vmem>>) attributes {dimension_semantics = [], scalar_prefetch = 0 : i64, scratch_operands = 0 : i64, tpu.core_type = #tpu.core_type<tc>} {
    %c0 = arith.constant 0 : index
    %c0_0 = arith.constant 0 : index
    %0 = vector.load %arg0[%c0, %c0_0] : memref<8x3xf32, #tpu.memory_space<vmem>>, vector<8x3xf32>
    %c0_1 = arith.constant 0 : index
    %c0_2 = arith.constant 0 : index
    %1 = vector.load %arg1[%c0_1, %c0_2] : memref<4x3xf32, #tpu.memory_space<vmem>>, vector<4x3xf32>
    %2 = vector.extract_strided_slice %1 {offsets = [3, 0], sizes = [1, 3], strides = [1, 1]} : vector<4x3xf32> to vector<1x3xf32>
    %3 = vector.extract_strided_slice %0 {offsets = [0, 0], sizes = [8, 1], strides = [1, 1]} : vector<8x3xf32> to vector<8x1xf32>
    %4 = vector.extract_strided_slice %1 {offsets = [0, 0], sizes = [1, 3], strides = [1, 1]} : vector<4x3xf32> to vector<1x3xf32>
    %5 = vector.broadcast %3 : vector<8x1xf32> to vector<8x3xf32>
    %6 = vector.broadcast %4 : vector<1x3xf32> to vector<8x3xf32>
    %7 = arith.mulf %5, %6 : vector<8x3xf32>
    %8 = vector.broadcast %2 : vector<1x3xf32> to vector<8x3xf32>
    %9 = arith.addf %8, %7 : vector<8x3xf32>
    %10 = vector.extract_strided_slice %0 {offsets = [0, 1], sizes = [8, 1], strides = [1, 1]} : vector<8x3xf32> to vector<8x1xf32>
    %11 = vector.extract_strided_slice %1 {offsets = [1, 0], sizes = [1, 3], strides = [1, 1]} : vector<4x3xf32> to vector<1x3xf32>
    %12 = vector.broadcast %10 : vector<8x1xf32> to vector<8x3xf32>
    %13 = vector.broadcast %11 : vector<1x3xf32> to vector<8x3xf32>
    %14 = arith.mulf %12, %13 : vector<8x3xf32>
    %15 = arith.addf %9, %14 : vector<8x3xf32>
    %16 = vector.extract_strided_slice %0 {offsets = [0, 2], sizes = [8, 1], strides = [1, 1]} : vector<8x3xf32> to vector<8x1xf32>
    %17 = vector.extract_strided_slice %1 {offsets = [2, 0], sizes = [1, 3], strides = [1, 1]} : vector<4x3xf32> to vector<1x3xf32>
    %18 = vector.broadcast %16 : vector<8x1xf32> to vector<8x3xf32>
    %19 = vector.broadcast %17 : vector<1x3xf32> to vector<8x3xf32>
    %20 = arith.mulf %18, %19 : vector<8x3xf32>
    %21 = arith.addf %15, %20 : vector<8x3xf32>
    %c0_3 = arith.constant 0 : index
    %c0_4 = arith.constant 0 : index
    %22 = vector.load %arg2[%c0_3, %c0_4] : memref<8x3xf32, #tpu.memory_space<vmem>>, vector<8x3xf32>
    tpu.vector_store %arg2[%c0_3, %c0_4], %21 {strides = array<i32>} : memref<8x3xf32, #tpu.memory_space<vmem>>, vector<8x3xf32>,
    return
  }
}

</mosaic_0001>

<bundles_post_ra>
// kernel: demo_model_forward.1
= control target key start
LH: loop header
LB: loop body
LE: loop exit
PB: predicated region body
PF: predicated region fallthrough
CT: control target
= control target key end

     0   :  { %v49_v0 = vmov 0   ;;  %v50_v2 = vmov 2   ;;  %v51_v3 = vmov 1   ;;  %vm36_vm0 = vcmask 23552   ;;  %s76_s0 = inlined_call_operand.vmem [shape: f32[8,3], index: 0, kind: input, shape index: {}]   ;;  %s77_s1 = inlined_call_operand.vmem [shape: f32[4,3], index: 1, kind: input, shape index: {}]   ;;  %s78_s2 = inlined_call_operand.vmem [shape: f32[8,3], index: 2, kind: output, shape index: {}]  }
   0x1   :  { %45 = vset.pattern.permute.xlu0 %v49_v0  ;;  %v11_v1 = vld [vmem:[%s76_s0] sm:$0xff]  ;;  %47 = vset.pattern.permute.xlu1 %v50_v2 }
   0x2   :  { %15 = vperm.xlu0 %45, %v11_v1   ;;  %30 = vperm.xlu1 %47, %v11_v1   ;;  %v12_v4 = vld [vmem:[%s77_s1] sm:$0xf] }
   0x3   :  { %v18_v6 = vperm.slane %v12_v4, 0  ;;  %v20_v7 = vperm.slane %v12_v4, 3  ;;  %v26_v9 = vperm.slane %v12_v4, 1  ;;  %v33_v10 = vperm.slane %v12_v4, 2 }
   0xa   :  { %46 = vset.pattern.permute.xlu0 %v51_v3 }
   0xb   :  { %23 = vperm.xlu0 %46, %v11_v1  }
  0x13   :  { %48 = vset.pattern.permute.xlu0 %v50_v2 }
  0x74   :  { %v16_v5 = vpop.permute.xlu0 %15  ;;  %v31_v11 = vpop.permute.xlu1 %30 }
  0x75   :  { %v19_v8 = vmul.f32 %v18_v6, %v16_v5  ;;  %v34_v15 = vmul.f32 %v33_v10, %v31_v11 }
  0x77   :  { %v21_v13 = vadd.f32 %v20_v7, %v19_v8 }
  0x7d   :  { %v24_v12 = vpop.permute.xlu0 %23 }
  0x7e   :  { %v27_v14 = vmul.f32 %v26_v9, %v24_v12 }
  0x80   :  { %v28_v16 = vadd.f32 %v27_v14, %v21_v13 }
  0x82   :  { %v35_v17 = vadd.f32 %v34_v15, %v28_v16 }
  0x84   :  { %37 = vst.msk [vmem:[%s78_s2] sm:$0xff] %vm36_vm0, %v35_v17 }

</bundles_post_ra>
